<compile_context>
chip_gen: v5e
topology: v5e:2x2
jax: 0.10.0
libtpu: 0.0.40
codegen_flags: <defaults>
</compile_context>

<pallas_src>
import jax
import jax.numpy as jnp
from jax.experimental import pallas as pl
from jax.experimental.pallas import tpu as pltpu


def _make_outconv_kernel(c_in, c_out):
    """Kernel for static channel counts: fully unrolled VPU FMAs."""

    def kernel(w_ref, b_ref, x_ref, o_ref):
        # w_ref: (C_out, C_in) f32 in SMEM
        # b_ref: (C_out,)      f32 in SMEM
        # x_ref: (tn, C_in,  ...) in VMEM  (trailing dims are (rt,128) or (ts,))
        # o_ref: (tn, C_out, ...) in VMEM
        for co in range(c_out):
            acc = x_ref[:, 0:1].astype(jnp.float32) * w_ref[co, 0]
            for ci in range(1, c_in):
                acc = acc + x_ref[:, ci:ci + 1].astype(jnp.float32) * w_ref[co, ci]
            # Direct, dense per-channel store (no concatenate relayout).
            o_ref[:, co:co + 1] = (acc + b_ref[co]).astype(o_ref.dtype)

    return kernel


def _choose_tiles(n, extent, budget, align):
    """Pick (tn, t_ext, grid_n, grid_ext) for a (batch, spatial) grid.

    `extent` is the per-image spatial extent (rows-of-128 for the 4-D path,
    raw elements for the 3-D path); `budget` is the target number of those
    units per grid step; `align` is the tiling granularity (8 or 128).
    """
    if extent >= budget:
        t_ext = max(align, (budget // align) * align)
        tn = 1
    else:
        t_ext = extent  # full extent: always a legal block dim
        tn = max(1, min(n, budget // max(extent, 1)))
    grid_n = pl.cdiv(n, tn)
    grid_e = pl.cdiv(extent, t_ext)
    # If the whole problem fits in one step, split it in two so both v7x
    # TensorCores get work (negligible cost on single-TC chips).
    if grid_n * grid_e == 1:
        if n >= 2:
            tn = (n + 1) // 2
            grid_n = pl.cdiv(n, tn)
        elif extent >= 2 * align:
            t_ext = (((extent + 1) // 2 + align - 1) // align) * align
            grid_e = pl.cdiv(extent, t_ext)
    return tn, t_ext, grid_n, grid_e


def outconv_forward(x_nchw, weight, bias, *, block_rows=1024):
    """1x1 conv (OutConv.forward).

    x_nchw: (N, C_in, H, W)
    weight: (C_out, C_in, 1, 1)   -- PyTorch Conv2d weight layout
    bias:   (C_out,)
    returns (N, C_out, H, W)

    block_rows=1024 -> ~3.5 MiB (in+out) per grid step for C_in=4, C_out=3;
    ~7 MiB double-buffered, safe for v5e's 16 MiB default scoped VMEM while
    large enough to amortize per-step overhead on v6e/v7x.
    """
    N, C_in, H, W = x_nchw.shape
    C_out = weight.shape[0]
    S = H * W

    w2d = weight.reshape(C_out, C_in).astype(jnp.float32)
    b1d = bias.reshape(C_out).astype(jnp.float32)
    kernel = _make_outconv_kernel(C_in, C_out)

    bytes_accessed = (N * S * (C_in + C_out)) * x_nchw.dtype.itemsize \
        + (w2d.size + b1d.size) * 4
    cost = pl.CostEstimate(
        flops=2 * N * S * C_in * C_out,
        transcendentals=0,
        bytes_accessed=bytes_accessed,
    )

    smem_spec = pl.BlockSpec(memory_space=pltpu.MemorySpace.SMEM)

    if S % 128 == 0:
        # Sublane-dense 4-D path: spatial axis viewed as (R, 128).
        R = S // 128
        x_v = x_nchw.reshape(N, C_in, R, 128)
        tn, rt, grid_n, grid_r = _choose_tiles(N, R, block_rows, 8)
        in_spec = pl.BlockSpec((tn, C_in, rt, 128), lambda n, r: (n, 0, r, 0))
        out_spec = pl.BlockSpec((tn, C_out, rt, 128), lambda n, r: (n, 0, r, 0))
        out_shape = jax.ShapeDtypeStruct((N, C_out, R, 128), x_nchw.dtype)
        grid = (grid_n, grid_r)
    else:
        # Fallback: lane-dense 3-D path (channels on sublanes) with big tiles.
        # TODO(synk): could pad S up to a multiple of 128 instead, at the cost
        # of an extra HBM pass for the pad/unpad copies.
        x_v = x_nchw.reshape(N, C_in, S)
        tn, ts, grid_n, grid_s = _choose_tiles(N, S, block_rows * 128, 128)
        in_spec = pl.BlockSpec((tn, C_in, ts), lambda n, s: (n, 0, s))
        out_spec = pl.BlockSpec((tn, C_out, ts), lambda n, s: (n, 0, s))
        out_shape = jax.ShapeDtypeStruct((N, C_out, S), x_nchw.dtype)
        grid = (grid_n, grid_s)

    out = pl.pallas_call(
        kernel,
        out_shape=out_shape,
        grid=grid,
        in_specs=[smem_spec, smem_spec, in_spec],
        out_specs=out_spec,
        compiler_params=pltpu.CompilerParams(
            dimension_semantics=("parallel", "parallel"),
        ),
        cost_estimate=cost,
    )(w2d, b1d, x_v)

    return out.reshape(N, C_out, H, W)


if __name__ == "__main__":
    key = jax.random.PRNGKey(0)
    k_x, k_w, k_b = jax.random.split(key, 3)

    N, C_in, C_out, Hs, Ws = 2, 4, 3, 16, 16

    x = jax.random.normal(k_x, (N, C_in, Hs, Ws), dtype=jnp.float32)
    # Deterministic parameter init (Conv2d shapes: (C_out, C_in, 1, 1), (C_out,))
    bound = 1.0 / (C_in ** 0.5)
    weight = jax.random.uniform(k_w, (C_out, C_in, 1, 1),
                                minval=-bound, maxval=bound, dtype=jnp.float32)
    bias = jax.random.uniform(k_b, (C_out,),
                              minval=-bound, maxval=bound, dtype=jnp.float32)

    y = outconv_forward(x, weight, bias)
    jax.block_until_ready(y)

    # Reference check against plain JAX (same math as nn.Conv2d with k=1).
    ref = jnp.einsum("nchw,oc->nohw", x, weight.reshape(C_out, C_in)) \
        + bias.reshape(1, C_out, 1, 1)
    assert y.shape == (N, C_out, Hs, Ws)
    assert jnp.allclose(y, ref, atol=1e-5, rtol=1e-5)

    print("KERNEL_OK")
</pallas_src>

<mosaic_0001>
module attributes {stable_mosaic.version = 11 : i64} {
  func.func @kernel(%arg0: i32, %arg1: i32, %arg2: memref<3x4xf32, #tpu.memory_space<smem>>, %arg3: memref<3xf32, #tpu.memory_space<smem>>, %arg4: memref<1x4x2x128xf32, #tpu.memory_space<vmem>>, %arg5: memref<1x3x2x128xf32, #tpu.memory_space<vmem>>) attributes {dimension_semantics = [#tpu.dimension_semantics<parallel>, #tpu.dimension_semantics<parallel>], iteration_bounds = array<i64: 2, 1>, scalar_prefetch = 0 : i64, scratch_operands = 0 : i64, tpu.core_type = #tpu.core_type<tc>, window_params = [{transform_indices = @transform_0, window_bounds = array<i64: 3, 4>}, {transform_indices = @transform_1, window_bounds = array<i64: 3>}, {transform_indices = @transform_2, window_bounds = array<i64: 1, 4, 2, 128>}, {transform_indices = @transform_3, window_bounds = array<i64: 1, 3, 2, 128>}]} {
    %c0 = arith.constant 0 : index
    %c0_0 = arith.constant 0 : index
    %c0_1 = arith.constant 0 : index
    %c0_2 = arith.constant 0 : index
    %0 = vector.load %arg4[%c0, %c0_0, %c0_1, %c0_2] : memref<1x4x2x128xf32, #tpu.memory_space<vmem>>, vector<1x1x2x128xf32>
    %c0_3 = arith.constant 0 : index
    %c0_4 = arith.constant 0 : index
    %1 = memref.load %arg2[%c0_3, %c0_4] : memref<3x4xf32, #tpu.memory_space<smem>>
    %2 = vector.broadcast %1 : f32 to vector<1x1x2x128xf32>
    %3 = arith.mulf %0, %2 : vector<1x1x2x128xf32>
    %c0_5 = arith.constant 0 : index
    %c1 = arith.constant 1 : index
    %c0_6 = arith.constant 0 : index
    %c0_7 = arith.constant 0 : index
    %4 = vector.load %arg4[%c0_5, %c1, %c0_6, %c0_7] : memref<1x4x2x128xf32, #tpu.memory_space<vmem>>, vector<1x1x2x128xf32>
    %c0_8 = arith.constant 0 : index
    %c1_9 = arith.constant 1 : index
    %5 = memref.load %arg2[%c0_8, %c1_9] : memref<3x4xf32, #tpu.memory_space<smem>>
    %6 = vector.broadcast %5 : f32 to vector<1x1x2x128xf32>
    %7 = arith.mulf %4, %6 : vector<1x1x2x128xf32>
    %8 = arith.addf %3, %7 : vector<1x1x2x128xf32>
    %c0_10 = arith.constant 0 : index
    %c2 = arith.constant 2 : index
    %c0_11 = arith.constant 0 : index
    %c0_12 = arith.constant 0 : index
    %9 = vector.load %arg4[%c0_10, %c2, %c0_11, %c0_12] : memref<1x4x2x128xf32, #tpu.memory_space<vmem>>, vector<1x1x2x128xf32>
    %c0_13 = arith.constant 0 : index
    %c2_14 = arith.constant 2 : index
    %10 = memref.load %arg2[%c0_13, %c2_14] : memref<3x4xf32, #tpu.memory_space<smem>>
    %11 = vector.broadcast %10 : f32 to vector<1x1x2x128xf32>
    %12 = arith.mulf %9, %11 : vector<1x1x2x128xf32>
    %13 = arith.addf %8, %12 : vector<1x1x2x128xf32>
    %c0_15 = arith.constant 0 : index
    %c3 = arith.constant 3 : index
    %c0_16 = arith.constant 0 : index
    %c0_17 = arith.constant 0 : index
    %14 = vector.load %arg4[%c0_15, %c3, %c0_16, %c0_17] : memref<1x4x2x128xf32, #tpu.memory_space<vmem>>, vector<1x1x2x128xf32>
    %c0_18 = arith.constant 0 : index
    %c3_19 = arith.constant 3 : index
    %15 = memref.load %arg2[%c0_18, %c3_19] : memref<3x4xf32, #tpu.memory_space<smem>>
    %16 = vector.broadcast %15 : f32 to vector<1x1x2x128xf32>
    %17 = arith.mulf %14, %16 : vector<1x1x2x128xf32>
    %18 = arith.addf %13, %17 : vector<1x1x2x128xf32>
    %c0_20 = arith.constant 0 : index
    %19 = memref.load %arg3[%c0_20] : memref<3xf32, #tpu.memory_space<smem>>
    %20 = vector.broadcast %19 : f32 to vector<1x1x2x128xf32>
    %21 = arith.addf %18, %20 : vector<1x1x2x128xf32>
    %c0_21 = arith.constant 0 : index
    %c0_22 = arith.constant 0 : index
    %c0_23 = arith.constant 0 : index
    %c0_24 = arith.constant 0 : index
    %22 = vector.load %arg5[%c0_21, %c0_22, %c0_23, %c0_24] : memref<1x3x2x128xf32, #tpu.memory_space<vmem>>, vector<1x1x2x128xf32>
    tpu.vector_store %arg5[%c0_21, %c0_22, %c0_23, %c0_24], %21 {strides = array<i32>} : memref<1x3x2x128xf32, #tpu.memory_space<vmem>>, vector<1x1x2x128xf32>,
    %c0_25 = arith.constant 0 : index
    %c0_26 = arith.constant 0 : index
    %c0_27 = arith.constant 0 : index
    %c0_28 = arith.constant 0 : index
    %23 = vector.load %arg4[%c0_25, %c0_26, %c0_27, %c0_28] : memref<1x4x2x128xf32, #tpu.memory_space<vmem>>, vector<1x1x2x128xf32>
    %c1_29 = arith.constant 1 : index
    %c0_30 = arith.constant 0 : index
    %24 = memref.load %arg2[%c1_29, %c0_30] : memref<3x4xf32, #tpu.memory_space<smem>>
    %25 = vector.broadcast %24 : f32 to vector<1x1x2x128xf32>
    %26 = arith.mulf %23, %25 : vector<1x1x2x128xf32>
    %c0_31 = arith.constant 0 : index
    %c1_32 = arith.constant 1 : index
    %c0_33 = arith.constant 0 : index
    %c0_34 = arith.constant 0 : index
    %27 = vector.load %arg4[%c0_31, %c1_32, %c0_33, %c0_34] : memref<1x4x2x128xf32, #tpu.memory_space<vmem>>, vector<1x1x2x128xf32>
    %c1_35 = arith.constant 1 : index
    %c1_36 = arith.constant 1 : index
    %28 = memref.load %arg2[%c1_35, %c1_36] : memref<3x4xf32, #tpu.memory_space<smem>>
    %29 = vector.broadcast %28 : f32 to vector<1x1x2x128xf32>
    %30 = arith.mulf %27, %29 : vector<1x1x2x128xf32>
    %31 = arith.addf %26, %30 : vector<1x1x2x128xf32>
    %c0_37 = arith.constant 0 : index
    %c2_38 = arith.constant 2 : index
    %c0_39 = arith.constant 0 : index
    %c0_40 = arith.constant 0 : index
    %32 = vector.load %arg4[%c0_37, %c2_38, %c0_39, %c0_40] : memref<1x4x2x128xf32, #tpu.memory_space<vmem>>, vector<1x1x2x128xf32>
    %c1_41 = arith.constant 1 : index
    %c2_42 = arith.constant 2 : index
    %33 = memref.load %arg2[%c1_41, %c2_42] : memref<3x4xf32, #tpu.memory_space<smem>>
    %34 = vector.broadcast %33 : f32 to vector<1x1x2x128xf32>
    %35 = arith.mulf %32, %34 : vector<1x1x2x128xf32>
    %36 = arith.addf %31, %35 : vector<1x1x2x128xf32>
    %c0_43 = arith.constant 0 : index
    %c3_44 = arith.constant 3 : index
    %c0_45 = arith.constant 0 : index
    %c0_46 = arith.constant 0 : index
    %37 = vector.load %arg4[%c0_43, %c3_44, %c0_45, %c0_46] : memref<1x4x2x128xf32, #tpu.memory_space<vmem>>, vector<1x1x2x128xf32>
    %c1_47 = arith.constant 1 : index
    %c3_48 = arith.constant 3 : index
    %38 = memref.load %arg2[%c1_47, %c3_48] : memref<3x4xf32, #tpu.memory_space<smem>>
    %39 = vector.broadcast %38 : f32 to vector<1x1x2x128xf32>
    %40 = arith.mulf %37, %39 : vector<1x1x2x128xf32>
    %41 = arith.addf %36, %40 : vector<1x1x2x128xf32>
    %c1_49 = arith.constant 1 : index
    %42 = memref.load %arg3[%c1_49] : memref<3xf32, #tpu.memory_space<smem>>
    %43 = vector.broadcast %42 : f32 to vector<1x1x2x128xf32>
    %44 = arith.addf %41, %43 : vector<1x1x2x128xf32>
    %c0_50 = arith.constant 0 : index
    %c1_51 = arith.constant 1 : index
    %c0_52 = arith.constant 0 : index
    %c0_53 = arith.constant 0 : index
    %45 = vector.load %arg5[%c0_50, %c1_51, %c0_52, %c0_53] : memref<1x3x2x128xf32, #tpu.memory_space<vmem>>, vector<1x1x2x128xf32>
    tpu.vector_store %arg5[%c0_50, %c1_51, %c0_52, %c0_53], %44 {strides = array<i32>} : memref<1x3x2x128xf32, #tpu.memory_space<vmem>>, vector<1x1x2x128xf32>,
    %c0_54 = arith.constant 0 : index
    %c0_55 = arith.constant 0 : index
    %c0_56 = arith.constant 0 : index
    %c0_57 = arith.constant 0 : index
    %46 = vector.load %arg4[%c0_54, %c0_55, %c0_56, %c0_57] : memref<1x4x2x128xf32, #tpu.memory_space<vmem>>, vector<1x1x2x128xf32>
    %c2_58 = arith.constant 2 : index
    %c0_59 = arith.constant 0 : index
    %47 = memref.load %arg2[%c2_58, %c0_59] : memref<3x4xf32, #tpu.memory_space<smem>>
    %48 = vector.broadcast %47 : f32 to vector<1x1x2x128xf32>
    %49 = arith.mulf %46, %48 : vector<1x1x2x128xf32>
    %c0_60 = arith.constant 0 : index
    %c1_61 = arith.constant 1 : index
    %c0_62 = arith.constant 0 : index
    %c0_63 = arith.constant 0 : index
    %50 = vector.load %arg4[%c0_60, %c1_61, %c0_62, %c0_63] : memref<1x4x2x128xf32, #tpu.memory_space<vmem>>, vector<1x1x2x128xf32>
    %c2_64 = arith.constant 2 : index
    %c1_65 = arith.constant 1 : index
    %51 = memref.load %arg2[%c2_64, %c1_65] : memref<3x4xf32, #tpu.memory_space<smem>>
    %52 = vector.broadcast %51 : f32 to vector<1x1x2x128xf32>
    %53 = arith.mulf %50, %52 : vector<1x1x2x128xf32>
    %54 = arith.addf %49, %53 : vector<1x1x2x128xf32>
    %c0_66 = arith.constant 0 : index
    %c2_67 = arith.constant 2 : index
    %c0_68 = arith.constant 0 : index
    %c0_69 = arith.constant 0 : index
    %55 = vector.load %arg4[%c0_66, %c2_67, %c0_68, %c0_69] : memref<1x4x2x128xf32, #tpu.memory_space<vmem>>, vector<1x1x2x128xf32>
    %c2_70 = arith.constant 2 : index
    %c2_71 = arith.constant 2 : index
    %56 = memref.load %arg2[%c2_70, %c2_71] : memref<3x4xf32, #tpu.memory_space<smem>>
    %57 = vector.broadcast %56 : f32 to vector<1x1x2x128xf32>
    %58 = arith.mulf %55, %57 : vector<1x1x2x128xf32>
    %59 = arith.addf %54, %58 : vector<1x1x2x128xf32>
    %c0_72 = arith.constant 0 : index
    %c3_73 = arith.constant 3 : index
    %c0_74 = arith.constant 0 : index
    %c0_75 = arith.constant 0 : index
    %60 = vector.load %arg4[%c0_72, %c3_73, %c0_74, %c0_75] : memref<1x4x2x128xf32, #tpu.memory_space<vmem>>, vector<1x1x2x128xf32>
    %c2_76 = arith.constant 2 : index
    %c3_77 = arith.constant 3 : index
    %61 = memref.load %arg2[%c2_76, %c3_77] : memref<3x4xf32, #tpu.memory_space<smem>>
    %62 = vector.broadcast %61 : f32 to vector<1x1x2x128xf32>
    %63 = arith.mulf %60, %62 : vector<1x1x2x128xf32>
    %64 = arith.addf %59, %63 : vector<1x1x2x128xf32>
    %c2_78 = arith.constant 2 : index
    %65 = memref.load %arg3[%c2_78] : memref<3xf32, #tpu.memory_space<smem>>
    %66 = vector.broadcast %65 : f32 to vector<1x1x2x128xf32>
    %67 = arith.addf %64, %66 : vector<1x1x2x128xf32>
    %c0_79 = arith.constant 0 : index
    %c2_80 = arith.constant 2 : index
    %c0_81 = arith.constant 0 : index
    %c0_82 = arith.constant 0 : index
    %68 = vector.load %arg5[%c0_79, %c2_80, %c0_81, %c0_82] : memref<1x3x2x128xf32, #tpu.memory_space<vmem>>, vector<1x1x2x128xf32>
    tpu.vector_store %arg5[%c0_79, %c2_80, %c0_81, %c0_82], %67 {strides = array<i32>} : memref<1x3x2x128xf32, #tpu.memory_space<vmem>>, vector<1x1x2x128xf32>,
    return
  }
  func.func @transform_0(%arg0: i32, %arg1: i32) -> (i32, i32) {
    %c0_i32 = arith.constant 0 : i32
    %c0_i32_0 = arith.constant 0 : i32
    %c0_i32_1 = arith.constant 0 : i32
    return %c0_i32, %c0_i32_0 : i32, i32
  }
  func.func @transform_1(%arg0: i32, %arg1: i32) -> i32 {
    %c0_i32 = arith.constant 0 : i32
    %c0_i32_0 = arith.constant 0 : i32
    return %c0_i32 : i32
  }
  func.func @transform_2(%arg0: i32, %arg1: i32) -> (i32, i32, i32, i32) {
    %c0_i32 = arith.constant 0 : i32
    %c0_i32_0 = arith.constant 0 : i32
    %c0_i32_1 = arith.constant 0 : i32
    return %arg0, %c0_i32, %arg1, %c0_i32_0 : i32, i32, i32, i32
  }
  func.func @transform_3(%arg0: i32, %arg1: i32) -> (i32, i32, i32, i32) {
    %c0_i32 = arith.constant 0 : i32
    %c0_i32_0 = arith.constant 0 : i32
    %c0_i32_1 = arith.constant 0 : i32
    return %arg0, %c0_i32, %arg1, %c0_i32_0 : i32, i32, i32, i32
  }
}

</mosaic_0001>

<bundles_post_ra>
// kernel: tpu_custom_call.1
= control target key start
LH: loop header
LB: loop body
LE: loop exit
PB: predicated region body
PF: predicated region fallthrough
CT: control target
= control target key end

     0   :  { %s920_s0 = inlined_call_operand.hbm [shape: f32[3,4], index: 0, kind: input, shape index: {}]   ;;  %s921_s1 = inlined_call_operand.hbm [shape: f32[3], index: 1, kind: input, shape index: {}]   ;;  %s922_s2 = inlined_call_operand.hbm [shape: f32[2,4,2,128], index: 2, kind: input, shape index: {}]   ;;  %s923_s3 = inlined_call_operand.hbm [shape: f32[2,3,2,128], index: 3, kind: output, shape index: {}]  }
   0x1   :  { %924 = sst [smem:[#allocation14_spill]] %s920_s0 }
   0x2   :  { %8 = vsyncpa [#allocation5], 0 }
   0x3   :  { %9 = vsyncpa [#allocation7], 0 }
   0x4   :  { %10 = vsyncpa [#allocation3], 0 }
   0x5   :  { %12 = vsyncpa [#allocation3 + $0x1], 0 }
   0x6   :  { %13 = vsyncpa [#allocation4], 0 }
   0x7   :  { %15 = vsyncpa [#allocation4 + $0x1], 0  ;;  %s741_s12 = smov 0   ;;  %s743_s13 = smov 0  }
   0x8   :  { %s745_s14 = smov 0   ;;  %s747_s15 = smov 0  }
   0x9   :  { %s749_s16 = smov 0   ;;  %s751_s17 = smov 0  }
   0xa LB: > { %s433_s18 = sadd.s32 4294967295, %s713_s17   ;;  %s434_s19 = sadd.s32 4294967294, %s713_s17   ;;  %s713_s17 = sphi %s751_s17, %s21_s17   ;;  %s709_s16 = sphi %s749_s16, %s937_s16   ;;  %s705_s15 = sphi %s747_s15, %s936_s15   ;;  %s701_s14 = sphi %s745_s14, %s935_s14   ;;  %s697_s13 = sphi %s743_s13, %s934_s13   ;;  %s693_s12 = sphi %s741_s12, %s933_s12  }
   0xb   : > { %s84_s20 = sadd.s32 1, %s701_s14  ;;  %p91_p0 = scmp.ne.s32.totalorder %s701_s14, %s697_s13 }
   0xc   : > { %p92_p1 = scmp.eq.s32.totalorder %s713_s17, 0  ;;  %p97_p2 = scmp.ne.s32.totalorder %s697_s13, %s693_s12 }
   0xd   : > { %p779_p3 = scmp.eq.s32.totalorder %s433_s18, 0  ;;  %p123_p4 = scmp.eq.s32.totalorder %s433_s18, 1 }
   0xe   : > { %p783_p5 = por %p92_p1, %p91_p0  ;;  %p129_p6 = scmp.eq.s32.totalorder %s434_s19, 1 }
   0xf   : > { %p789_p7 = por %p779_p3, %p97_p2  ;;  %p793_p8 = por %p123_p4, %p91_p0 }
  0x10   : > { %p797_p9 = por %p129_p6, %p97_p2  ;;  %p435_p10 = scmp.ge.s32.totalorder %s713_s17, 1 }
  0x11   : > { %p136_p11 = scmp.lt.s32.totalorder %s713_s17, 3  ;;  %s930_s0 = sld [smem:[#allocation14_spill]] }
  0x12   : > { %p438_p13 = scmp.ge.s32.totalorder %s713_s17, 2  ;;  %p505_p0 = scmp.lt.s32.totalorder %s713_s17, 2 }
  0x13   : > { %p806_p12 = pnand %p435_p10, %p136_p11  ;;  %s158_s5 = sshll.u32 %s921_s1, 4  ;;  %s159_s5 = int_to_ptr.hbm [resolvable:$true] %s158_s5 }
  0x14   : > { %p819_p2 = pnand %p505_p0, %p783_p5  ;;  %s715_s7 = smov [#allocation2]  }
  0x15   : > { %p488_p1 = pneg %p806_p12  ;;  %s716_s8 = smov [#allocation6]  }
  0x16   : > { %s33_s9 = sadd.s32 1, %s709_s16  ;;  %s169_s10 = sand.u32 1, %s701_s14  }
  0x17   : > { %s148_s28 = sshll.u32 %s930_s0, 4  ;;  %p489_p4 = pnand %p488_p1, %p779_p3  ;;  %s149_s28 = int_to_ptr.hbm [resolvable:$true] %s148_s28 }
  0x18   : > { %p35_p6 = scmp.ge.s32.totalorder %s33_s9, 2  ;;  %s439_s11 = sshll.u32 %s169_s10, 3 }
  0x19   : > { %491 = dma.hbm_to_smem (!%p489_p4), %s149_s28, 64, %s715_s7, [#allocation5]  }
  0x1a   : > { %494 = dma.hbm_to_smem (!%p489_p4), %s159_s5, 16, %s716_s8, [#allocation7]  }
  0x1b   : > { %s473_s18 = sshll.u32 %s709_s16, 3  ;;  %s939_s9 = smov (%p35_p6, %s33_s9), 0 }
  0x1c   : > { %s179_s26 = scalar_lea.hbm %s922_s2, %s473_s18  ;;  %s79_s27 = ssub.s32 %s709_s16, %s939_s9 }
  0x1d   : > { %s180_s30 = sshll.u32 %s179_s26, 4  ;;  %p82_p5 = scmp.eq.s32.totalorder %s79_s27, 0  ;;  %s181_s30 = int_to_ptr.hbm [resolvable:$true] %s180_s30 }
  0x1e   : > { %s173_s28 = scalar_lea.vmem [#allocation8], %s439_s11  ;;  %s170_s7 = scalar_lea.sflag [#allocation3], %s169_s10 }
  0x1f   : > { %s182_s4 = sshll.u32 %s173_s28, 4  ;;  %s717_s8 = smov 32   ;;  %s183_s4 = int_to_ptr.vmem [resolvable:$true] %s182_s4 }
  0x20   : > { %s838_s5 = scalar_select %p82_p5, %s701_s14, %s84_s20  }
  0x21   : > { %s718_s0 = smov 2   ;;  %194 = sbr.rel (%p806_p12) target bundleno = 79 (0x4f), region = 32 }
  0x22   : > { %498 = dma.hbm_to_vmem [thread:$0]  (!%p819_p2), %s181_s30, 128, %s183_s4, %s170_s7, %s717_s8, %s717_s8, %s718_s0  }
  0x26   : > { %676 = dma.done.wait (%p779_p3), [#allocation5], 64  }
  0x27   : > { %678 = vsyncadd (%p779_p3), [#allocation5], 4294967232 }
  0x28   : > { %680 = dma.done.wait (%p779_p3), [#allocation7], 16  }
  0x29   : > { %682 = vsyncadd (%p779_p3), [#allocation7], 4294967280  ;;  %s853_s20 = sand.u32 1, %s697_s13  }
  0x2a   : > { %s445_s0 = sshll.u32 %s853_s20, 3  ;;  %s207_s29 = scalar_lea.sflag [#allocation3], %s853_s20 }
  0x2b   : > { %s857_s6 = scalar_lea.vmem [#allocation8], %s445_s0 }
  0x2c   : > { %684 = dma.done.wait (%p789_p7), %s207_s29, 128  }
  0x2d   : > { %686 = vsyncadd (%p789_p7), %s207_s29, 4294967168 }
  0x2e   : > { %216 = sfence }
  0x2f   : > { %s236_s10 = sld [smem:[#allocation2]]  ;;  %v235_v0 = vld [vmem:[%s857_s6] sm:$0x3]  ;;  %v446_v1 = vld [vmem:[%s857_s6 + $0x2] sm:$0x3]  ;;  %s474_s4 = smul.u32 6, %s853_s20 }
  0x30   : > { %s447_s21 = sld [smem:[#allocation2 + $0x1]]  ;;  %v448_v3 = vld [vmem:[%s857_s6 + $0x4] sm:$0x3]  ;;  %v450_v6 = vld [vmem:[%s857_s6 + $0x6] sm:$0x3] }
  0x31   : > { %s449_s11 = sld [smem:[#allocation2 + $0x2]]  ;;  %v261_v11 = vld [vmem:[%s857_s6] sm:$0x3]  ;;  %v453_v14 = vld [vmem:[%s857_s6 + $0x2] sm:$0x3] }
  0x32   : > { %s451_s18 = sld [smem:[#allocation2 + $0x3]]  ;;  %v455_v16 = vld [vmem:[%s857_s6 + $0x4] sm:$0x3]  ;;  %v457_v20 = vld [vmem:[%s857_s6 + $0x6] sm:$0x3] }
  0x33   : > { %s864_s19 = sld [smem:[#allocation6]]  ;;  %v285_v27 = vld [vmem:[%s857_s6] sm:$0x3]  ;;  %v462_v30 = vld [vmem:[%s857_s6 + $0x2] sm:$0x3] }
  0x34   : > { %s452_s22 = sld [smem:[#allocation2 + $0x80]]  ;;  %v464_v33 = vld [vmem:[%s857_s6 + $0x4] sm:$0x3]  ;;  %v466_v37 = vld [vmem:[%s857_s6 + $0x6] sm:$0x3] }
  0x35   : > { %v237_v2 = vstv %s236_s10  ;;  %s454_s23 = sld [smem:[#allocation2 + $0x81]]  ;;  %s475_s10 = smul.u32 6, %s705_s15 }
  0x36   : > { %v238_v4 = vmul.f32 %v237_v2, %v235_v0  ;;  %v242_v5 = vstv %s447_s21  ;;  %s456_s26 = sld [smem:[#allocation2 + $0x82]]  ;;  %s234_s21 = scalar_lea.vmem [#allocation9], %s474_s4 }
  0x37   : > { %v243_v7 = vmul.f32 %v446_v1, %v242_v5  ;;  %v248_v8 = vstv %s449_s11  ;;  %s458_s27 = sld [smem:[#allocation2 + $0x83]]  ;;  %s323_s15 = sshll.u32 %s234_s21, 4  ;;  %s324_s15 = int_to_ptr.vmem [resolvable:$true] %s323_s15 }
  0x38   : > { %v249_v9 = vmul.f32 %v448_v3, %v248_v8  ;;  %v254_v10 = vstv %s451_s18  ;;  %s870_s30 = sld [smem:[#allocation6 + $0x1]] }
  0x39   : > { %v244_v12 = vadd.f32 %v243_v7, %v238_v4  ;;  %v255_v13 = vmul.f32 %v450_v6, %v254_v10  ;;  %s461_s28 = sld [smem:[#allocation2 + $0x100]]  ;;  %v258_v21 = vstv %s864_s19  ;;  %s322_s19 = scalar_lea.hbm %s923_s3, %s475_s10 }
  0x3a   : > { %v263_v15 = vstv %s452_s22  ;;  %s463_s7 = sld [smem:[#allocation2 + $0x101]]  ;;  %s325_s6 = sshll.u32 %s322_s19, 4  ;;  %s326_s6 = int_to_ptr.hbm [resolvable:$true] %s325_s6 }
  0x3b   : > { %v250_v17 = vadd.f32 %v249_v9, %v244_v12  ;;  %v264_v18 = vmul.f32 %v263_v15, %v261_v11  ;;  %v267_v19 = vstv %s454_s23  ;;  %s465_s8 = sld [smem:[#allocation2 + $0x102]]  ;;  %s310_s22 = scalar_lea.sflag [#allocation4], %s853_s20 }
  0x3c   : > { %v268_v22 = vmul.f32 %v453_v14, %v267_v19  ;;  %v272_v23 = vstv %s456_s26  ;;  %s467_s0 = sld [smem:[#allocation2 + $0x103]]  ;;  %s637_s23 = sshra.s32 %s326_s6, 4  ;;  %s638_s23 = int_to_ptr.hbm [resolvable:$true] %s637_s23 }
  0x3d   : > { %v256_v24 = vadd.f32 %v255_v13, %v250_v17  ;;  %v273_v25 = vmul.f32 %v455_v16, %v272_v23  ;;  %v277_v26 = vstv %s458_s27  ;;  %s468_s29 = sld [smem:[#allocation6 + $0x2]]  ;;  %s639_s26 = scalar_lea.hbm %s638_s23, 6 }
  0x3e   : > { %v269_v28 = vadd.f32 %v268_v22, %v264_v18  ;;  %v278_v29 = vmul.f32 %v457_v20, %v277_v26  ;;  %v281_v38 = vstv %s870_s30  ;;  %p640_p3 = scmp.ne.s32.totalorder %s638_s23, %s639_s26  ;;  %p644_p11 = scmp.lt.s32.totalorder %s638_s23, %s923_s3 }
  0x3f   : > { %v259_v31 = vadd.f32 %v258_v21, %v256_v24  ;;  %v287_v32 = vstv %s461_s28  ;;  %s643_s28 = scalar_lea.hbm %s923_s3, 12 }
  0x40   : > { %v274_v34 = vadd.f32 %v273_v25, %v269_v28  ;;  %v288_v35 = vmul.f32 %v287_v32, %v285_v27  ;;  %v291_v36 = vstv %s463_s7  ;;  %p641_p7 = pnand %p640_p3, %p793_p8  ;;  %p645_p12 = scmp.lt.s32.totalorder %s643_s28, %s639_s26 }
  0x41   : > { %260 = vst [vmem:[%s234_s21] sm:$0x3] %v259_v31  ;;  %v292_v39 = vmul.f32 %v462_v30, %v291_v36  ;;  %v296_v40 = vstv %s465_s8 }
  0x42   : > { %v279_v41 = vadd.f32 %v278_v29, %v274_v34  ;;  %v297_v42 = vmul.f32 %v464_v33, %v296_v40  ;;  %v301_v43 = vstv %s467_s0  ;;  %p642_p10 = pneg %p641_p7  ;;  %p646_p0 = por %p645_p12, %p644_p11 }
  0x43   : > { %v293_v44 = vadd.f32 %v292_v39, %v288_v35  ;;  %v302_v45 = vmul.f32 %v466_v37, %v301_v43  ;;  %v305_v48 = vstv %s468_s29 }
  0x44   : > { %v282_v46 = vadd.f32 %v281_v38, %v279_v41  ;;  %p647_p1 = pnand %p646_p0, %p642_p10 }
  0x45   : > { %v298_v47 = vadd.f32 %v297_v42, %v293_v44 }
  0x46   : > { %460 = vst [vmem:[%s234_s21 + $0x2] sm:$0x3] %v282_v46 }
  0x47   : > { %v303_v49 = vadd.f32 %v302_v45, %v298_v47 }
  0x49   : > { %v306_v50 = vadd.f32 %v305_v48, %v303_v49 }
  0x4b   : > { %469 = vst [vmem:[%s234_s21 + $0x4] sm:$0x3] %v306_v50 }
  0x4c   : > { %650 = shalt.err (!%p647_p1)
}
  0x4d   : > { %s719_s20 = smov 32   ;;  %s720_s8 = smov 2  }
  0x4e   : > { %486 = dma.vmem_to_hbm [thread:$0]  (%p793_p8), %s324_s15, 96, %s326_s6, %s310_s22, %s719_s20, %s719_s20, %s720_s8  }
  0x4f PF: > { %s340_s0 = sand.u32 1, %s693_s12   ;;  %p500_p2 = pnand %p438_p13, %p797_p9 }
  0x50   : > { %s341_s29 = scalar_lea.sflag [#allocation4], %s340_s0 }
  0x51   : > { %p501_p4 = pneg %p500_p2 }
  0x53   : > { %688 = dma.done.wait (%p501_p4), %s341_s29, 96  }
  0x54   : > { %690 = vsyncadd (%p501_p4), %s341_s29, 4294967200  ;;  %s21_s17 = sadd.s32 1, %s713_s17   ;;  %s933_s12 = smov %s697_s13 }
  0x55   : > { %p18_p6 = scmp.ge.s32.totalorder %s21_s17, 4   ;;  %s934_s13 = smov %s701_s14 }
  0x56   : > { %s935_s14 = smov %s838_s5  ;;  %s936_s15 = smov %s709_s16 }
  0x57   : > { %s937_s16 = smov %s939_s9  ;;  %20 = sbr.rel (!%p18_p6) target bundleno = 10 (0xa), region = 91 }
  0x5c   :  { %347 = vsyncpa [#allocation3], 1 }
  0x5d   :  { %349 = vsyncpa [#allocation3 + $0x1], 1 }
  0x5e   :  { %350 = vsyncpa [#allocation4], 1 }
  0x5f   :  { %352 = vsyncpa [#allocation4 + $0x1], 1 }
  0x60   :  { %353 = vsyncpa [#allocation5], 1 }
  0x61   :  { %355 = vsyncpa [#allocation5 + $0x1], 1 }
  0x62   :  { %356 = vsyncpa [#allocation7], 1 }

</bundles_post_ra>
